<compile_context>
chip_gen: v7x
topology: tpu7x:2x2x1
jax: 0.10.0
libtpu: 0.0.40
codegen_flags: <defaults>
</compile_context>

<pallas_src>
import numpy as np
import jax
import jax.numpy as jnp
from jax.experimental import pallas as pl
from jax.experimental.pallas import tpu as pltpu


def _motion_enhance_kernel(scale_ref, x_ref, o_ref):
    # scale_ref: (2,) f32 in SMEM -> [1/(1-lam), lam/((1-lam)*T)]
    # x_ref / o_ref: (bc_tile, T, hw_tile) blocks in VMEM
    inv = scale_ref[0]
    coef_t = scale_ref[1]
    x = x_ref[...]
    # Temporal sum over T (sublane axis), accumulated in f32; 1/T is folded into coef_t.
    s = jnp.sum(x, axis=1, keepdims=True, dtype=jnp.float32)
    if x.dtype == jnp.float32:
        out = x * inv - s * coef_t
    else:
        # Keep bulk elementwise work in the native (sub-32-bit) dtype; only the small
        # (bc_tile, 1, hw_tile) reduced term was accumulated in f32 and is downcast once.
        out = x * inv.astype(x.dtype) - (s * coef_t).astype(x.dtype)
    o_ref[...] = out.astype(o_ref.dtype)


def _vmem_capacity_bytes():
    # Generation-aware VMEM query; fall back to the most restrictive (v7x, 64 MiB).
    try:
        return int(pltpu.get_tpu_info().vmem_capacity_bytes)
    except Exception:
        return 64 * 1024 * 1024


def motion_enhance(x, lam):
    """x: (B, C, T, H, W) array, lam: python/scalar float (< 1). Returns same shape."""
    assert lam < 1.0, "lam must be < 1 (1/(1-lam) undefined otherwise)"
    b, c, t, h, w = x.shape
    hw = h * w
    bc = b * c
    x2 = x.reshape(bc, t, hw)

    itemsize = jnp.dtype(x.dtype).itemsize
    row_bytes = t * hw * itemsize

    vmem_cap = _vmem_capacity_bytes()
    if vmem_cap <= 64 * 1024 * 1024:
        # v7x: 64 MiB physical VMEM -> ~8 MiB blocks, hard cap ~48 MiB scoped VMEM.
        target_block_bytes = 8 * 1024 * 1024
        vmem_budget_cap = 48 * 1024 * 1024
    else:
        # v5e / v6e: 128 MiB physical VMEM -> bigger blocks amortize per-step overhead.
        target_block_bytes = 14 * 1024 * 1024
        vmem_budget_cap = 96 * 1024 * 1024

    if row_bytes <= target_block_bytes:
        # Tile only the fused B*C axis; keep the full (T, HW) row per block so the last
        # two block dims equal the array dims (no lane padding required).
        hw_tile = hw
        bc_tile = max(1, min(bc, target_block_bytes // row_bytes))
        if bc >= 4:
            # Keep >= 4 grid steps so each v7x TensorCore gets >= 2 pipelined steps
            # (hides one block's DMA prologue/epilogue per core).
            bc_tile = min(bc_tile, max(1, bc // 4))
    else:
        # A single (1, T, HW) row is bigger than the budget (video-sized frames):
        # additionally tile HW in multiples of 128.  The T-mean is per-lane, so HW
        # tiles are fully independent (no cross-tile reduction needed).
        bc_tile = 1
        lanes_per_block = max(1, target_block_bytes // (t * itemsize))
        hw_tile = max(128, (lanes_per_block // 128) * 128)
        hw_tile = min(hw_tile, hw)
        if hw <= 128:
            hw_tile = hw  # cannot split below one lane group; last dim == full dim is legal

    n_bc = pl.cdiv(bc, bc_tile)
    n_hw = pl.cdiv(hw, hw_tile)
    grid = (n_bc, n_hw)

    # Hoist all scalar math out of the kernel (1/T folded into the mean coefficient).
    inv = 1.0 / (1.0 - lam)
    scale = jnp.asarray([inv, (lam * inv) / t], dtype=jnp.float32)

    # Explicit VMEM budget: double-buffered (input + output) blocks plus slack, clamped
    # to a generation-appropriate cap (never above physical VMEM minus headroom).
    block_bytes = bc_tile * t * hw_tile * itemsize
    vmem_limit = int(min(vmem_budget_cap,
                         max(32 * 1024 * 1024, 4 * block_bytes + (2 << 20))))

    # NOTE: for sub-32-bit dtypes with small T (< sublane packing of 16/32), Mosaic may
    # pad T internally; block sizes here stay well under budget so this is only a
    # footprint note, not a correctness issue.
    out = pl.pallas_call(
        _motion_enhance_kernel,
        out_shape=jax.ShapeDtypeStruct((bc, t, hw), x.dtype),
        grid=grid,
        in_specs=[
            pl.BlockSpec(memory_space=pltpu.SMEM),                          # [inv, lam*inv/T]
            pl.BlockSpec((bc_tile, t, hw_tile), lambda i, j: (i, 0, j)),    # x block
        ],
        out_specs=pl.BlockSpec((bc_tile, t, hw_tile), lambda i, j: (i, 0, j)),
        compiler_params=pltpu.CompilerParams(
            dimension_semantics=("parallel", "parallel"),
            vmem_limit_bytes=vmem_limit,
        ),
    )(scale, x2)

    return out.reshape(b, c, t, h, w)


def motion_enhance_ref(x, lam):
    mean = jnp.mean(x, axis=2, keepdims=True)
    return (x - mean * lam) * (1.0 / (1.0 - lam))


if __name__ == "__main__":
    # Deterministic "random" lam, matching np.random.beta(beta, beta) * maxium_radio
    # (host-side draw, exactly like the PyTorch module's forward).
    beta, maxium_radio = 1.0, 0.3
    rng = np.random.default_rng(0)
    lam = float(rng.beta(beta, beta) * maxium_radio)

    key = jax.random.PRNGKey(0)
    k1, k2, k3 = jax.random.split(key, 3)

    # Main test: f32, H*W a multiple of 128.
    B, C, T, H, W = 2, 4, 8, 16, 16
    x = jax.random.normal(k1, (B, C, T, H, W), dtype=jnp.float32)
    out = jax.block_until_ready(motion_enhance(x, lam))
    ref = motion_enhance_ref(x, lam)
    assert out.shape == (B, C, T, H, W)
    np.testing.assert_allclose(np.asarray(out), np.asarray(ref), rtol=1e-5, atol=1e-5)

    # Odd spatial size: H*W = 100 is NOT a multiple of 128 -> exercises the masked
    # edge-store path (no wrapper pad/slice round-trip anymore).
    x_odd = jax.random.normal(k2, (2, 3, 8, 10, 10), dtype=jnp.float32)
    out_odd = jax.block_until_ready(motion_enhance(x_odd, lam))
    ref_odd = motion_enhance_ref(x_odd, lam)
    np.testing.assert_allclose(np.asarray(out_odd), np.asarray(ref_odd), rtol=1e-5, atol=1e-5)

    # Low-precision sanity check (bf16 path keeps bulk math in bf16, sum in f32).
    x_bf = jax.random.normal(k3, (B, C, T, H, W), dtype=jnp.bfloat16)
    out_bf = jax.block_until_ready(motion_enhance(x_bf, lam))
    ref_bf = motion_enhance_ref(x_bf.astype(jnp.float32), lam)
    np.testing.assert_allclose(np.asarray(out_bf).astype(np.float32),
                               np.asarray(ref_bf), rtol=2e-2, atol=5e-2)

    print("KERNEL_OK")
</pallas_src>

<mosaic_0001>
module attributes {stable_mosaic.version = 11 : i64} {
  func.func @_motion_enhance_kernel(%arg0: i32, %arg1: i32, %arg2: memref<2xf32, #tpu.memory_space<smem>>, %arg3: memref<2x8x256xf32, #tpu.memory_space<vmem>>, %arg4: memref<2x8x256xf32, #tpu.memory_space<vmem>>) attributes {dimension_semantics = [#tpu.dimension_semantics<parallel>, #tpu.dimension_semantics<parallel>], iteration_bounds = array<i64: 4, 1>, scalar_prefetch = 0 : i64, scratch_operands = 0 : i64, tpu.core_type = #tpu.core_type<tc>, window_params = [{transform_indices = @transform_0, window_bounds = array<i64: 2>}, {transform_indices = @transform_1, window_bounds = array<i64: 2, 8, 256>}, {transform_indices = @transform_2, window_bounds = array<i64: 2, 8, 256>}]} {
    %c0 = arith.constant 0 : index
    %0 = memref.load %arg2[%c0] : memref<2xf32, #tpu.memory_space<smem>>
    %c1 = arith.constant 1 : index
    %1 = memref.load %arg2[%c1] : memref<2xf32, #tpu.memory_space<smem>>
    %c0_0 = arith.constant 0 : index
    %c0_1 = arith.constant 0 : index
    %c0_2 = arith.constant 0 : index
    %2 = vector.load %arg3[%c0_0, %c0_1, %c0_2] : memref<2x8x256xf32, #tpu.memory_space<vmem>>, vector<2x8x256xf32>
    %cst = arith.constant dense<0.000000e+00> : vector<2x256xf32>
    %3 = vector.multi_reduction <add>, %2, %cst [1] : vector<2x8x256xf32> to vector<2x256xf32>
    %4 = vector.shape_cast %3 : vector<2x256xf32> to vector<2x1x256xf32>
    %5 = vector.broadcast %0 : f32 to vector<2x8x256xf32>
    %6 = arith.mulf %2, %5 : vector<2x8x256xf32>
    %7 = vector.broadcast %1 : f32 to vector<2x1x256xf32>
    %8 = arith.mulf %4, %7 : vector<2x1x256xf32>
    %9 = vector.broadcast %8 : vector<2x1x256xf32> to vector<2x8x256xf32>
    %10 = arith.subf %6, %9 : vector<2x8x256xf32>
    %c0_3 = arith.constant 0 : index
    %c0_4 = arith.constant 0 : index
    %c0_5 = arith.constant 0 : index
    %11 = vector.load %arg4[%c0_3, %c0_4, %c0_5] : memref<2x8x256xf32, #tpu.memory_space<vmem>>, vector<2x8x256xf32>
    tpu.vector_store %arg4[%c0_3, %c0_4, %c0_5], %10 {strides = array<i32>} : memref<2x8x256xf32, #tpu.memory_space<vmem>>, vector<2x8x256xf32>,
    return
  }
  func.func @transform_0(%arg0: i32, %arg1: i32) -> i32 {
    %c0_i32 = arith.constant 0 : i32
    %c0_i32_0 = arith.constant 0 : i32
    return %c0_i32 : i32
  }
  func.func @transform_1(%arg0: i32, %arg1: i32) -> (i32, i32, i32) {
    %c0_i32 = arith.constant 0 : i32
    %c0_i32_0 = arith.constant 0 : i32
    return %arg0, %c0_i32, %arg1 : i32, i32, i32
  }
  func.func @transform_2(%arg0: i32, %arg1: i32) -> (i32, i32, i32) {
    %c0_i32 = arith.constant 0 : i32
    %c0_i32_0 = arith.constant 0 : i32
    return %arg0, %c0_i32, %arg1 : i32, i32, i32
  }
}

</mosaic_0001>

<bundles_post_ra>
// kernel: tpu_custom_call.1
= control target key start
LH: loop header
LB: loop body
LE: loop exit
PB: predicated region body
PF: predicated region fallthrough
CT: control target
= control target key end

     0   :  { %7 = vsyncpa [#allocation5], 0  ;;  %s818_s0 = inlined_call_operand.hbm [shape: f32[2], index: 0, kind: input, shape index: {}]   ;;  %s819_s1 = inlined_call_operand.hbm [shape: f32[8,8,256], index: 1, kind: input, shape index: {}]   ;;  %s820_s2 = inlined_call_operand.hbm [shape: f32[8,8,256], index: 2, kind: output, shape index: {}]  }
   0x1   :  { %8 = vsyncpa [#allocation3], 0 }
   0x2   :  { %10 = vsyncpa [#allocation3 + $0x1], 0 }
   0x3   :  { %11 = vsyncpa [#allocation4], 0 }
   0x4   :  { %13 = vsyncpa [#allocation4 + $0x1], 0  ;;  %s615_s9 = smov 0   ;;  %s617_s10 = smov 0  }
   0x5   :  { %s619_s11 = smov 0   ;;  %s621_s12 = smov 0  }
   0x6   :  { %s623_s13 = smov 0   ;;  %s625_s14 = smov 0  }
   0x7 LB: > { %s361_s15 = sadd.s32 4294967295, %s591_s14   ;;  %s362_s16 = sadd.s32 4294967294, %s591_s14   ;;  %s591_s14 = sphi %s625_s14, %s19_s14   ;;  %s587_s13 = sphi %s623_s13, %s839_s13   ;;  %s583_s12 = sphi %s621_s12, %s838_s12   ;;  %s579_s11 = sphi %s619_s11, %s837_s11   ;;  %s575_s10 = sphi %s617_s10, %s836_s10   ;;  %s571_s9 = sphi %s615_s9, %s835_s9  }
   0x8   : > { %s61_s17 = sadd.s32 1, %s579_s11  ;;  %p68_p0 = scmp.ne.s32.totalorder %s579_s11, %s575_s10 }
   0x9   : > { %p69_p1 = scmp.eq.s32.totalorder %s591_s14, 0  ;;  %p74_p2 = scmp.ne.s32.totalorder %s575_s10, %s571_s9 }
   0xa   : > { %p653_p3 = scmp.eq.s32.totalorder %s361_s15, 0  ;;  %p100_p4 = scmp.eq.s32.totalorder %s361_s15, 3 }
   0xb   : > { %p70_p5 = por %p69_p1, %p68_p0  ;;  %p106_p6 = scmp.eq.s32.totalorder %s362_s16, 3 }
   0xc   : > { %s825_s18 = scalar_select %p653_p3, 1, 0 }
   0xd   : > { %p659_p7 = por %p653_p3, %p74_p2  ;;  %p663_p8 = por %p100_p4, %p68_p0 }
   0xe   : > { %p667_p9 = por %p106_p6, %p74_p2  ;;  %p363_p10 = scmp.ge.s32.totalorder %s591_s14, 1 }
   0xf   : > { %s826_s19 = scalar_select %p659_p7, 1, 0 }
  0x10   : > { %s827_s20 = scalar_select %p663_p8, 1, 0 }
  0x11   : > { %s828_s21 = scalar_select %p667_p9, 1, 0 }
  0x12   : > { %p113_p11 = scmp.lt.s32.totalorder %s591_s14, 5  ;;  %p406_p13 = scmp.lt.s32.totalorder %s591_s14, 4 }
  0x13   : > { %s135_s23 = sand.u32 1, %s579_s11   ;;  %s31_s25 = sadd.s32 1, %s587_s13 }
  0x14   : > { %p673_p12 = pnand %p363_p10, %p113_p11  ;;  %p681_p7 = pnand %p406_p13, %p70_p5 }
  0x15   : > { %s366_s26 = sshll.u32 %s135_s23, 5  ;;  %p33_p2 = scmp.ge.s32.totalorder %s31_s25, 4 }
  0x16   : > { %p393_p1 = pneg %p673_p12  ;;  %s462_s29 = scalar_lea.hbm %s818_s0, 16 }
  0x17   : > { %p463_p4 = scmp.ne.s32.totalorder %s818_s0, %s462_s29  ;;  %p469_p5 = scmp.lt.u32.totalorder %s462_s29, %s818_s0 }
  0x18   : > { %p394_p0 = pnand %p393_p1, %p653_p3 }
  0x1a   : > { %p464_p6 = pneg %p394_p0 }
  0x1c   : > { %p465_p10 = pnand %p464_p6, %p463_p4 }
  0x1e   : > { %p466_p11 = pneg %p465_p10 }
  0x20   : > { %p471_p13 = pnand %p469_p5, %p466_p11 }
  0x22   : > { %474 = shalt.err (!%p471_p13)
}
  0x23   : > { %s593_s6 = smov [#allocation2]   ;;  %s841_s25 = smov (%p33_p2, %s31_s25), 0 }
  0x24   : > { %396 = dma.hbm_to_smem (!%p394_p0), %s818_s0, 16, %s593_s6, [#allocation5]  }
  0x25   : > { %s382_s15 = sshll.u32 %s587_s13, 9  ;;  %s56_s16 = ssub.s32 %s587_s13, %s841_s25 }
  0x26   : > { %s708_s29 = scalar_lea.hbm %s819_s1, %s382_s15  ;;  %p59_p1 = scmp.eq.s32.totalorder %s56_s16, 0 }
  0x27   : > { %s139_s30 = scalar_lea.vmem [#allocation6], %s366_s26  ;;  %s717_s5 = scalar_lea.sflag [#allocation3], %s135_s23 }
  0x28   : > { %s149_s3 = sshll.u32 %s139_s30, 4  ;;  %s475_s6 = scalar_lea.hbm %s708_s29, 512  ;;  %s710_s3 = int_to_ptr.vmem [resolvable:$true] %s149_s3 }
  0x29   : > { %s715_s4 = scalar_select %p59_p1, %s579_s11, %s61_s17  }
  0x2a   : > { %p476_p0 = scmp.ne.s32.totalorder %s708_s29, %s475_s6  ;;  %p477_p2 = pneg %p681_p7 }
  0x2b   : > { %s480_s26 = scalar_lea.hbm %s819_s1, 2048  ;;  %p481_p10 = scmp.lt.u32.totalorder %s708_s29, %s819_s1 }
  0x2c   : > { %p478_p4 = pnand %p477_p2, %p476_p0  ;;  %p482_p11 = scmp.lt.u32.totalorder %s480_s26, %s475_s6 }
  0x2d   : > { %p484_p13 = scmp.lt.u32.totalorder %s475_s6, %s708_s29 }
  0x2e   : > { %p479_p6 = pneg %p478_p4  ;;  %p483_p5 = por %p482_p11, %p481_p10 }
  0x30   : > { %p485_p1 = por %p484_p13, %p483_p5 }
  0x32   : > { %p486_p9 = pnand %p485_p1, %p479_p6 }
  0x34   : > { %489 = shalt.err (!%p486_p9)
}
  0x35   : > { %s490_s17 = scalar_lea.vmem %s710_s3, 512  ;;  %s594_s23 = smov [#allocation6]  }
  0x36   : > { %p491_p0 = scmp.ne.s32.totalorder %s710_s3, %s490_s17  ;;  %s495_s27 = sshll.u32 %s594_s23, 4  ;;  %s496_s27 = int_to_ptr.vmem [resolvable:$false] %s495_s27 }
  0x37   : > { %s497_s28 = scalar_lea.vmem %s496_s27, 1024  ;;  %p498_p3 = scmp.lt.s32.totalorder %s710_s3, %s496_s27 }
  0x38   : > { %p493_p4 = pnand %p491_p0, %p477_p2  ;;  %p499_p10 = scmp.lt.s32.totalorder %s497_s28, %s490_s17 }
  0x3a   : > { %p494_p8 = pneg %p493_p4  ;;  %p500_p11 = por %p499_p10, %p498_p3 }
  0x3c   : > { %p501_p5 = pnand %p500_p11, %p494_p8 }
  0x3e   : > { %504 = shalt.err (!%p501_p5)
}
  0x3f   : > { %s595_s30 = smov 256   ;;  %s596_s6 = smov 16  }
  0x40   : > { %400 = dma.hbm_to_vmem [thread:$0]  (!%p681_p7), %s708_s29, 512, %s710_s3, %s717_s5, %s595_s30, %s595_s30, %s596_s6  }
  0x41   : > { %161 = sbr.rel (%p673_p12) target bundleno = 112 (0x70), region = 28  ;;  %p831_p9 = scmp.ne.s32.totalorder (!%p673_p12), %s825_s18, 0 }
  0x48   : > { %558 = dma.done.wait (%p831_p9), [#allocation5], 16  }
  0x49   : > { %560 = vsyncadd (%p831_p9), [#allocation5], 4294967280  ;;  %s752_s7 = sand.u32 1, %s575_s10   ;;  %p832_p3 = scmp.ne.s32.totalorder %s826_s19, 0 }
  0x4a   : > { %s372_s8 = sshll.u32 %s752_s7, 5  ;;  %s168_s26 = scalar_lea.sflag [#allocation3], %s752_s7 }
  0x4b   : > { %s171_s24 = scalar_lea.vmem [#allocation6], %s372_s8 }
  0x4c   : > { %562 = dma.done.wait (%p832_p3), %s168_s26, 512  }
  0x4d   : > { %564 = vsyncadd (%p832_p3), %s168_s26, 4294966784 }
  0x4e   : > { %176 = sfence }
  0x4f   : > { %s197_s22 = sld [smem:[#allocation2]]  ;;  %v199_v0 = vld [vmem:[%s171_s24] sm:$0xff]  ;;  %v200_v1 = vld [vmem:[%s171_s24 + $0x8] sm:$0xff]  ;;  %v201_v2 = vld [vmem:[%s171_s24 + $0x10] sm:$0xff]  ;;  %s374_s18 = sld [smem:[#allocation2 + $0x1]] }
  0x50   : > { %v203_v3 = vrot.slane %v199_v0, 4  ;;  %v209_v4 = vrot.slane %v200_v1, 4  ;;  %v215_v5 = vrot.slane %v201_v2, 4  ;;  %v202_v6 = vld [vmem:[%s171_s24 + $0x18] sm:$0xff]  ;;  %s192_s19 = scalar_lea.vmem [#allocation7], %s372_s8  ;;  %s384_s3 = sshll.u32 %s583_s12, 9 }
  0x51   : > { %v221_v10 = vrot.slane %v202_v6, 4  ;;  %s262_s29 = sshll.u32 %s192_s19, 4  ;;  %s770_s16 = scalar_lea.hbm %s820_s2, %s384_s3  ;;  %s765_s29 = int_to_ptr.vmem [resolvable:$true] %s262_s29 }
  0x52   : > { %v204_v7 = vadd.f32 %v203_v3, %v199_v0  ;;  %v210_v8 = vadd.f32 %v209_v4, %v200_v1  ;;  %v216_v9 = vadd.f32 %v215_v5, %v201_v2  ;;  %s246_s17 = scalar_lea.sflag [#allocation4], %s752_s7  ;;  %s505_s23 = scalar_lea.vmem %s765_s29, 512 }
  0x53   : > { %v222_v14 = vadd.f32 %v221_v10, %v202_v6  ;;  %p506_p7 = scmp.ne.s32.totalorder %s765_s29, %s505_s23  ;;  %p833_p8 = scmp.ne.s32.totalorder %s827_s20, 0 }
  0x54   : > { %v205_v11 = vrot.slane %v204_v7, 2  ;;  %v211_v12 = vrot.slane %v210_v8, 2  ;;  %v217_v13 = vrot.slane %v216_v9, 2  ;;  %s597_s12 = smov [#allocation7]  }
  0x55   : > { %v227_v17 = vstv %s197_s22  ;;  %v223_v19 = vrot.slane %v222_v14, 2  ;;  %v232_v22 = vstv %s374_s18  ;;  %p507_p12 = pnand %p506_p7, %p833_p8  ;;  %s509_s27 = sshll.u32 %s597_s12, 4  ;;  %s510_s27 = int_to_ptr.vmem [resolvable:$false] %s509_s27 }
  0x56   : > { %v206_v15 = vadd.f32 %v205_v11, %v204_v7  ;;  %v212_v16 = vadd.f32 %v211_v12, %v210_v8  ;;  %v218_v18 = vadd.f32 %v217_v13, %v216_v9  ;;  %v228_v26 = vmul.f32 %v227_v17, %v199_v0  ;;  %s511_s28 = scalar_lea.vmem %s510_s27, 1024  ;;  %p512_p6 = scmp.lt.s32.totalorder %s765_s29, %s510_s27 }
  0x57   : > { %v224_v24 = vadd.f32 %v223_v19, %v222_v14  ;;  %v229_v28 = vmul.f32 %v227_v17, %v200_v1  ;;  %v230_v30 = vmul.f32 %v227_v17, %v201_v2  ;;  %v231_v36 = vmul.f32 %v227_v17, %v202_v6  ;;  %p508_p2 = pneg %p507_p12  ;;  %p513_p13 = scmp.lt.s32.totalorder %s511_s28, %s505_s23 }
  0x58   : > { %v207_v20 = vrot.slane %v206_v15, 1  ;;  %v213_v21 = vrot.slane %v212_v16, 1  ;;  %v219_v23 = vrot.slane %v218_v18, 1 }
  0x59   : > { %v225_v31 = vrot.slane %v224_v24, 1  ;;  %p514_p1 = por %p513_p13, %p512_p6 }
  0x5a   : > { %v208_v25 = vadd.f32 %v207_v20, %v206_v15  ;;  %v214_v27 = vadd.f32 %v213_v21, %v212_v16  ;;  %v220_v29 = vadd.f32 %v219_v23, %v218_v18 }
  0x5b   : > { %v226_v35 = vadd.f32 %v225_v31, %v224_v24  ;;  %p515_p0 = pnand %p514_p1, %p508_p2 }
  0x5c   : > { %v233_v32 = vmul.f32 %v232_v22, %v208_v25  ;;  %v234_v33 = vmul.f32 %v232_v22, %v214_v27  ;;  %v235_v34 = vmul.f32 %v232_v22, %v220_v29 }
  0x5d   : > { %v236_v40 = vmul.f32 %v232_v22, %v226_v35 }
  0x5e   : > { %v237_v37 = vsub.f32 %v228_v26, %v233_v32  ;;  %v238_v38 = vsub.f32 %v229_v28, %v234_v33  ;;  %v239_v39 = vsub.f32 %v230_v30, %v235_v34 }
  0x5f   : > { %v240_v41 = vsub.f32 %v231_v36, %v236_v40 }
  0x60   : > { %241 = vst [vmem:[%s192_s19] sm:$0xff] %v237_v37  ;;  %242 = vst [vmem:[%s192_s19 + $0x8] sm:$0xff] %v238_v38 }
  0x61   : > { %243 = vst [vmem:[%s192_s19 + $0x10] sm:$0xff] %v239_v39  ;;  %244 = vst [vmem:[%s192_s19 + $0x18] sm:$0xff] %v240_v41 }
  0x62   : > { %518 = shalt.err (!%p515_p0)
}
  0x63   : > { %s519_s30 = scalar_lea.hbm %s770_s16, 512  ;;  %s523_s26 = scalar_lea.hbm %s820_s2, 2048 }
  0x64   : > { %p520_p4 = scmp.ne.s32.totalorder %s770_s16, %s519_s30  ;;  %p524_p5 = scmp.lt.u32.totalorder %s770_s16, %s820_s2 }
  0x65   : > { %p525_p9 = scmp.lt.u32.totalorder %s523_s26, %s519_s30  ;;  %p527_p7 = scmp.lt.u32.totalorder %s519_s30, %s770_s16 }
  0x66   : > { %p521_p10 = pnand %p520_p4, %p833_p8 }
  0x67   : > { %p526_p3 = por %p525_p9, %p524_p5 }
  0x68   : > { %p522_p11 = pneg %p521_p10 }
  0x69   : > { %p528_p12 = por %p527_p7, %p526_p3 }
  0x6b   : > { %p529_p2 = pnand %p528_p12, %p522_p11 }
  0x6d   : > { %532 = shalt.err (!%p529_p2)
}
  0x6e   : > { %s598_s18 = smov 256   ;;  %s599_s19 = smov 16  }
  0x6f   : > { %391 = dma.vmem_to_hbm [thread:$0]  (%p833_p8), %s765_s29, 512, %s770_s16, %s246_s17, %s598_s18, %s598_s18, %s599_s19  }
  0x70 PF: > { %p408_p6 = scmp.ge.s32.totalorder %s591_s14, 2  ;;  %s277_s3 = sand.u32 1, %s571_s9  }
  0x71   : > { %p834_p13 = scmp.ne.s32.totalorder %s828_s21, 0  ;;  %s278_s5 = scalar_lea.sflag [#allocation4], %s277_s3 }
  0x73   : > { %p402_p1 = pnand %p408_p6, %p834_p13 }
  0x75   : > { %566 = dma.done.wait (!%p402_p1), %s278_s5, 512  }
  0x76   : > { %568 = vsyncadd (!%p402_p1), %s278_s5, 4294966784  ;;  %s19_s14 = sadd.s32 1, %s591_s14   ;;  %s835_s9 = smov %s575_s10 }
  0x77   : > { %p16_p0 = scmp.ge.s32.totalorder %s19_s14, 6   ;;  %s836_s10 = smov %s579_s11 }
  0x78   : > { %s837_s11 = smov %s715_s4  ;;  %s838_s12 = smov %s587_s13 }
  0x79   : > { %s839_s13 = smov %s841_s25  ;;  %18 = sbr.rel (!%p16_p0) target bundleno = 7 (0x7), region = 78 }
  0x80   :  { %283 = vsyncpa [#allocation3], 1 }
  0x81   :  { %285 = vsyncpa [#allocation3 + $0x1], 1 }
  0x82   :  { %286 = vsyncpa [#allocation4], 1 }
  0x83   :  { %288 = vsyncpa [#allocation4 + $0x1], 1 }
  0x84   :  { %289 = vsyncpa [#allocation5], 1 }
  0x85   :  { %291 = vsyncpa [#allocation5 + $0x1], 1 }

</bundles_post_ra>
